<compile_context>
chip_gen: v7x
topology: tpu7x:2x2x1
jax: 0.10.0
libtpu: 0.0.40
codegen_flags: <defaults>
</compile_context>

<pallas_src>
import functools

import jax
import jax.numpy as jnp
from jax import lax
from jax.experimental import pallas as pl
from jax.experimental.pallas import tpu as pltpu

LANE = 128


def _round_up(n, m):
    return ((n + m - 1) // m) * m


# --------------------------------------------------------------------------
# Kernel
# --------------------------------------------------------------------------
def tcn_fused_kernel(*refs, layers):
    """All TemporalBlocks fused; one grid step handles one batch element.

    refs: x_ref (1, T, C0_pad), then per layer (w1p, b1p, w2p, b2p), then
    o_ref (1, T, C_last_pad).

    layers: static tuple of (cout_pad, shifts, has_ds) per layer, where
    `shifts` are the live causal tap shifts (descending, last entry is 0) in
    the same order the tap row-blocks were packed into w*p.
    """
    x_ref = refs[0]
    o_ref = refs[-1]
    w = refs[1:-1]

    def causal_shift(v, s):
        # result[t] = v[t - s], zero for t < s  (chomp-fused causal alignment)
        if s == 0:
            return v
        rolled = pltpu.roll(v, shift=s, axis=0)          # XLU, co-issues w/ VALU
        t_idx = lax.broadcasted_iota(jnp.int32, v.shape, 0)
        return jnp.where(t_idx >= s, rolled, jnp.zeros_like(rolled))

    def causal_matmul(v, shifts, w_ref, b_ref):
        # v: (T, Cpad) f32.  im2col: taps along the contraction dim.
        taps = [causal_shift(v, s) for s in shifts]
        lhs = taps[0] if len(taps) == 1 else jnp.concatenate(taps, axis=1)
        y = jnp.dot(lhs.astype(jnp.bfloat16), w_ref[...],
                    preferred_element_type=jnp.float32)
        return y + b_ref[...]

    x = x_ref[0].astype(jnp.float32)                      # (T, C0_pad)
    idx = 0
    for (cout_pad, shifts, has_ds) in layers:
        w1p, b1p, w2p, b2p = w[idx], w[idx + 1], w[idx + 2], w[idx + 3]
        idx += 4
        # conv1 (+ fused 1x1 downsample columns) + chomp + relu
        y1 = causal_matmul(x, shifts, w1p, b1p)           # (T, cout_pad[*2])
        h = jnp.maximum(y1[:, :cout_pad], 0.0)            # dropout1 = identity
        res = y1[:, cout_pad:] if has_ds else x           # residual path
        # conv2 + chomp + relu
        h2 = jnp.maximum(causal_matmul(h, shifts, w2p, b2p), 0.0)  # dropout2 = id
        x = jnp.maximum(h2 + res, 0.0)

    o_ref[...] = x[None].astype(o_ref.dtype)


def make_tcn_call(B, T, cin0_pad, layers, weight_shapes, dtype):
    c_last_pad = layers[-1][0]
    kernel = functools.partial(tcn_fused_kernel, layers=layers)
    in_specs = [pl.BlockSpec((1, T, cin0_pad), lambda b: (b, 0, 0))]
    for shp in weight_shapes:                              # weights: one block,
        in_specs.append(pl.BlockSpec(shp, lambda b: (0, 0)))  # resident in VMEM
    return pl.pallas_call(
        kernel,
        out_shape=jax.ShapeDtypeStruct((B, T, c_last_pad), dtype),
        grid=(B,),
        in_specs=in_specs,
        out_specs=pl.BlockSpec((1, T, c_last_pad), lambda b: (b, 0, 0)),
        compiler_params=pltpu.CompilerParams(
            dimension_semantics=("parallel",),            # megacore on v7x
            vmem_limit_bytes=32 * 1024 * 1024),
    )


# --------------------------------------------------------------------------
# Params: init (matches TemporalBlock.init_weights N(0, 0.01)) and packing
# --------------------------------------------------------------------------
def init_tcn_params(key, num_inputs, num_channels, kernel_size):
    params = []
    for i, out_ch in enumerate(num_channels):
        in_ch = num_inputs if i == 0 else num_channels[i - 1]
        key, k1, k2, k3, k4, k5, k6 = jax.random.split(key, 7)
        p = dict(
            w1=0.01 * jax.random.normal(k1, (out_ch, in_ch, kernel_size), jnp.float32),
            b1=0.01 * jax.random.normal(k2, (out_ch,), jnp.float32),
            w2=0.01 * jax.random.normal(k3, (out_ch, out_ch, kernel_size), jnp.float32),
            b2=0.01 * jax.random.normal(k4, (out_ch,), jnp.float32),
            wd=None, bd=None,
            dilation=2 ** i, in_ch=in_ch, out_ch=out_ch,
        )
        if in_ch != out_ch:
            p["wd"] = 0.01 * jax.random.normal(k5, (out_ch, in_ch, 1), jnp.float32)
            p["bd"] = 0.01 * jax.random.normal(k6, (out_ch,), jnp.float32)
        params.append(p)
    return params


def pack_tcn_params(params, kernel_size, T):
    """One-time repack: im2col weight layout, lane-padded, bf16, dead taps
    dropped, 1x1 downsample fused into conv1's N columns."""
    K = kernel_size
    packed, metas = [], []
    for p in params:
        cin, cout, d = p["in_ch"], p["out_ch"], p["dilation"]
        cin_pad = _round_up(cin, LANE)
        cout_pad = _round_up(cout, LANE)
        has_ds = p["wd"] is not None
        valid_js = [j for j in range(K) if (K - 1 - j) * d < T]   # drop dead taps
        shifts = tuple((K - 1 - j) * d for j in valid_js)         # descending, last=0
        n_taps = len(valid_js)

        # conv1: (n_taps*cin_pad, cout_pad [+ cout_pad for fused downsample])
        ncols1 = cout_pad * (2 if has_ds else 1)
        w1p = jnp.zeros((n_taps * cin_pad, ncols1), jnp.float32)
        for t, j in enumerate(valid_js):
            blk = jnp.transpose(p["w1"][:, :, j])                 # (cin, cout)
            w1p = w1p.at[t * cin_pad:t * cin_pad + cin, :cout].set(blk)
        b1p = jnp.zeros((1, ncols1), jnp.float32).at[0, :cout].set(p["b1"])
        if has_ds:
            t0 = n_taps - 1                                       # s == 0 tap block
            wd = jnp.transpose(p["wd"][:, :, 0])                  # (cin, cout)
            w1p = w1p.at[t0 * cin_pad:t0 * cin_pad + cin,
                         cout_pad:cout_pad + cout].set(wd)
            b1p = b1p.at[0, cout_pad:cout_pad + cout].set(p["bd"])

        # conv2: (n_taps*cout_pad, cout_pad)
        w2p = jnp.zeros((n_taps * cout_pad, cout_pad), jnp.float32)
        for t, j in enumerate(valid_js):
            blk = jnp.transpose(p["w2"][:, :, j])                 # (cout, cout)
            w2p = w2p.at[t * cout_pad:t * cout_pad + cout, :cout].set(blk)
        b2p = jnp.zeros((1, cout_pad), jnp.float32).at[0, :cout].set(p["b2"])

        packed.append(dict(w1p=w1p.astype(jnp.bfloat16), b1p=b1p,
                           w2p=w2p.astype(jnp.bfloat16), b2p=b2p,
                           out_ch=cout))
        metas.append((cout_pad, shifts, has_ds))
    return packed, tuple(metas)


# --------------------------------------------------------------------------
# Wrapper
# --------------------------------------------------------------------------
def temporal_conv_net_pallas(x_nct, packed, metas, kernel_size):
    """x_nct: (B, C, T) as in PyTorch; returns (B, C_out_last, T)."""
    B, C_in, T = x_nct.shape
    cin0_pad = _round_up(C_in, LANE)
    x = jnp.transpose(x_nct, (0, 2, 1))                           # (B, T, C_in)
    x = jnp.pad(x, ((0, 0), (0, 0), (0, cin0_pad - C_in)))        # lane-pad chans

    args, weight_shapes = [x], []
    for p in packed:
        for name in ("w1p", "b1p", "w2p", "b2p"):
            args.append(p[name])
            weight_shapes.append(p[name].shape)

    call = make_tcn_call(B, T, cin0_pad, metas, tuple(weight_shapes), x.dtype)
    y = call(*args)                                               # (B, T, Cpad)
    c_last = packed[-1]["out_ch"]
    return jnp.transpose(y[:, :, :c_last], (0, 2, 1))             # (B, C, T)


# --------------------------------------------------------------------------
# Pure-JAX reference (mirrors the PyTorch forward, eval mode, f32)
# --------------------------------------------------------------------------
def tcn_reference(x_nct, params, kernel_size):
    x = x_nct
    T = x.shape[2]

    def conv(inp, w, b, dil, padding):
        out = lax.conv_general_dilated(
            inp, w, window_strides=(1,), padding=[(padding, padding)],
            rhs_dilation=(dil,), dimension_numbers=("NCH", "OIH", "NCH"))
        return out + b[None, :, None]

    for p in params:
        d = p["dilation"]
        pad = (kernel_size - 1) * d
        h = conv(x, p["w1"], p["b1"], d, pad)[:, :, :T]           # conv1 + chomp
        h = jnp.maximum(h, 0.0)
        h2 = conv(h, p["w2"], p["b2"], d, pad)[:, :, :T]          # conv2 + chomp
        h2 = jnp.maximum(h2, 0.0)
        res = x if p["wd"] is None else conv(x, p["wd"], p["bd"], 1, 0)
        x = jnp.maximum(h2 + res, 0.0)
    return x


if __name__ == "__main__":
    key = jax.random.PRNGKey(0)
    key, xkey, pkey = jax.random.split(key, 3)

    # Small config: num_inputs=4, num_channels=[8, 8], kernel_size=2, T=16
    B, C_in, T = 2, 4, 16
    num_channels = [8, 8]
    kernel_size = 2

    x = jax.random.normal(xkey, (B, C_in, T), jnp.float32)        # PyTorch NCL
    params = init_tcn_params(pkey, C_in, num_channels, kernel_size)
    packed, metas = pack_tcn_params(params, kernel_size, T)

    out = temporal_conv_net_pallas(x, packed, metas, kernel_size)
    out = jax.block_until_ready(out)

    ref = jax.block_until_ready(tcn_reference(x, params, kernel_size))

    assert out.shape == (B, num_channels[-1], T), out.shape
    # bf16 MXU operands -> loosened tolerance vs the f32 reference.
    if not jnp.allclose(out, ref, rtol=5e-2, atol=5e-3):
        raise AssertionError(
            "mismatch: max abs err = %g" % float(jnp.max(jnp.abs(out - ref))))
    print("KERNEL_OK")
</pallas_src>

<mosaic_0001>
module attributes {stable_mosaic.version = 11 : i64} {
  func.func @tcn_fused_kernel(%arg0: i32, %arg1: memref<1x16x128xf32, #tpu.memory_space<vmem>>, %arg2: memref<256x256xbf16, #tpu.memory_space<vmem>>, %arg3: memref<1x256xf32, #tpu.memory_space<vmem>>, %arg4: memref<256x128xbf16, #tpu.memory_space<vmem>>, %arg5: memref<1x128xf32, #tpu.memory_space<vmem>>, %arg6: memref<256x128xbf16, #tpu.memory_space<vmem>>, %arg7: memref<1x128xf32, #tpu.memory_space<vmem>>, %arg8: memref<256x128xbf16, #tpu.memory_space<vmem>>, %arg9: memref<1x128xf32, #tpu.memory_space<vmem>>, %arg10: memref<1x16x128xf32, #tpu.memory_space<vmem>>) attributes {dimension_semantics = [#tpu.dimension_semantics<parallel>], iteration_bounds = array<i64: 2>, scalar_prefetch = 0 : i64, scratch_operands = 0 : i64, tpu.core_type = #tpu.core_type<tc>, window_params = [{transform_indices = @transform_0, window_bounds = array<i64: 1, 16, 128>}, {pipeline_mode = #tpu.pipeline_mode<synchronous>, transform_indices = @transform_1, window_bounds = array<i64: 256, 256>}, {pipeline_mode = #tpu.pipeline_mode<synchronous>, transform_indices = @transform_2, window_bounds = array<i64: 1, 256>}, {pipeline_mode = #tpu.pipeline_mode<synchronous>, transform_indices = @transform_3, window_bounds = array<i64: 256, 128>}, {pipeline_mode = #tpu.pipeline_mode<synchronous>, transform_indices = @transform_4, window_bounds = array<i64: 1, 128>}, {pipeline_mode = #tpu.pipeline_mode<synchronous>, transform_indices = @transform_5, window_bounds = array<i64: 256, 128>}, {pipeline_mode = #tpu.pipeline_mode<synchronous>, transform_indices = @transform_6, window_bounds = array<i64: 1, 128>}, {pipeline_mode = #tpu.pipeline_mode<synchronous>, transform_indices = @transform_7, window_bounds = array<i64: 256, 128>}, {pipeline_mode = #tpu.pipeline_mode<synchronous>, transform_indices = @transform_8, window_bounds = array<i64: 1, 128>}, {transform_indices = @transform_9, window_bounds = array<i64: 1, 16, 128>}]} {
    %c0 = arith.constant 0 : index
    %c0_0 = arith.constant 0 : index
    %c0_1 = arith.constant 0 : index
    %0 = vector.load %arg1[%c0, %c0_0, %c0_1] : memref<1x16x128xf32, #tpu.memory_space<vmem>>, vector<1x16x128xf32>
    %1 = vector.shape_cast %0 : vector<1x16x128xf32> to vector<16x128xf32>
    %c1_i32 = arith.constant 1 : i32
    %2 = tpu.dynamic_rotate %1 by %c1_i32 dim 0 : vector<16x128xf32>, i32 -> vector<16x128xf32>
    %3 = tpu.iota {dimensions = array<i32: 0>} : vector<16x128xi32>
    %c1_i32_2 = arith.constant 1 : i32
    %4 = vector.broadcast %c1_i32_2 : i32 to vector<16x128xi32>
    %5 = arith.cmpi sge, %3, %4 : vector<16x128xi32>
    %cst = arith.constant 0.000000e+00 : f32
    %6 = vector.broadcast %cst : f32 to vector<16x128xf32>
    %7 = arith.select %5, %2, %6 : vector<16x128xi1>, vector<16x128xf32>
    %8 = tpu.concatenate %7, %1 in 1 : vector<16x128xf32>, vector<16x128xf32> -> vector<16x256xf32>
    %9 = arith.truncf %8 : vector<16x256xf32> to vector<16x256xbf16>
    %c0_3 = arith.constant 0 : index
    %c0_4 = arith.constant 0 : index
    %10 = vector.load %arg2[%c0_3, %c0_4] : memref<256x256xbf16, #tpu.memory_space<vmem>>, vector<256x256xbf16>
    %cst_5 = arith.constant dense<0.000000e+00> : vector<16x256xf32>
    %11 = tpu.matmul %9, %10, %cst_5 {dimension_numbers = #tpu.dot_dimension_numbers<[1], [0], [0], [1], [0, 0, 1, 1], [], []>} : vector<16x256xbf16>, vector<256x256xbf16>, vector<16x256xf32> -> vector<16x256xf32>
    %c0_6 = arith.constant 0 : index
    %c0_7 = arith.constant 0 : index
    %12 = vector.load %arg3[%c0_6, %c0_7] : memref<1x256xf32, #tpu.memory_space<vmem>>, vector<1x256xf32>
    %13 = vector.broadcast %12 : vector<1x256xf32> to vector<16x256xf32>
    %14 = arith.addf %11, %13 : vector<16x256xf32>
    %15 = vector.extract_strided_slice %14 {offsets = [0, 0], sizes = [16, 128], strides = [1, 1]} : vector<16x256xf32> to vector<16x128xf32>
    %cst_8 = arith.constant 0.000000e+00 : f32
    %16 = vector.broadcast %cst_8 : f32 to vector<16x128xf32>
    %17 = arith.maximumf %15, %16 : vector<16x128xf32>
    %18 = vector.extract_strided_slice %14 {offsets = [0, 128], sizes = [16, 128], strides = [1, 1]} : vector<16x256xf32> to vector<16x128xf32>
    %c1_i32_9 = arith.constant 1 : i32
    %19 = tpu.dynamic_rotate %17 by %c1_i32_9 dim 0 : vector<16x128xf32>, i32 -> vector<16x128xf32>
    %20 = tpu.iota {dimensions = array<i32: 0>} : vector<16x128xi32>
    %c1_i32_10 = arith.constant 1 : i32
    %21 = vector.broadcast %c1_i32_10 : i32 to vector<16x128xi32>
    %22 = arith.cmpi sge, %20, %21 : vector<16x128xi32>
    %cst_11 = arith.constant 0.000000e+00 : f32
    %23 = vector.broadcast %cst_11 : f32 to vector<16x128xf32>
    %24 = arith.select %22, %19, %23 : vector<16x128xi1>, vector<16x128xf32>
    %25 = tpu.concatenate %24, %17 in 1 : vector<16x128xf32>, vector<16x128xf32> -> vector<16x256xf32>
    %26 = arith.truncf %25 : vector<16x256xf32> to vector<16x256xbf16>
    %c0_12 = arith.constant 0 : index
    %c0_13 = arith.constant 0 : index
    %27 = vector.load %arg4[%c0_12, %c0_13] : memref<256x128xbf16, #tpu.memory_space<vmem>>, vector<256x128xbf16>
    %cst_14 = arith.constant dense<0.000000e+00> : vector<16x128xf32>
    %28 = tpu.matmul %26, %27, %cst_14 {dimension_numbers = #tpu.dot_dimension_numbers<[1], [0], [0], [1], [0, 0, 1, 1], [], []>} : vector<16x256xbf16>, vector<256x128xbf16>, vector<16x128xf32> -> vector<16x128xf32>
    %c0_15 = arith.constant 0 : index
    %c0_16 = arith.constant 0 : index
    %29 = vector.load %arg5[%c0_15, %c0_16] : memref<1x128xf32, #tpu.memory_space<vmem>>, vector<1x128xf32>
    %30 = vector.broadcast %29 : vector<1x128xf32> to vector<16x128xf32>
    %31 = arith.addf %28, %30 : vector<16x128xf32>
    %cst_17 = arith.constant 0.000000e+00 : f32
    %32 = vector.broadcast %cst_17 : f32 to vector<16x128xf32>
    %33 = arith.maximumf %31, %32 : vector<16x128xf32>
    %34 = arith.addf %33, %18 : vector<16x128xf32>
    %cst_18 = arith.constant 0.000000e+00 : f32
    %35 = vector.broadcast %cst_18 : f32 to vector<16x128xf32>
    %36 = arith.maximumf %34, %35 : vector<16x128xf32>
    %c2_i32 = arith.constant 2 : i32
    %37 = tpu.dynamic_rotate %36 by %c2_i32 dim 0 : vector<16x128xf32>, i32 -> vector<16x128xf32>
    %38 = tpu.iota {dimensions = array<i32: 0>} : vector<16x128xi32>
    %c2_i32_19 = arith.constant 2 : i32
    %39 = vector.broadcast %c2_i32_19 : i32 to vector<16x128xi32>
    %40 = arith.cmpi sge, %38, %39 : vector<16x128xi32>
    %cst_20 = arith.constant 0.000000e+00 : f32
    %41 = vector.broadcast %cst_20 : f32 to vector<16x128xf32>
    %42 = arith.select %40, %37, %41 : vector<16x128xi1>, vector<16x128xf32>
    %43 = tpu.concatenate %42, %36 in 1 : vector<16x128xf32>, vector<16x128xf32> -> vector<16x256xf32>
    %44 = arith.truncf %43 : vector<16x256xf32> to vector<16x256xbf16>
    %c0_21 = arith.constant 0 : index
    %c0_22 = arith.constant 0 : index
    %45 = vector.load %arg6[%c0_21, %c0_22] : memref<256x128xbf16, #tpu.memory_space<vmem>>, vector<256x128xbf16>
    %cst_23 = arith.constant dense<0.000000e+00> : vector<16x128xf32>
    %46 = tpu.matmul %44, %45, %cst_23 {dimension_numbers = #tpu.dot_dimension_numbers<[1], [0], [0], [1], [0, 0, 1, 1], [], []>} : vector<16x256xbf16>, vector<256x128xbf16>, vector<16x128xf32> -> vector<16x128xf32>
    %c0_24 = arith.constant 0 : index
    %c0_25 = arith.constant 0 : index
    %47 = vector.load %arg7[%c0_24, %c0_25] : memref<1x128xf32, #tpu.memory_space<vmem>>, vector<1x128xf32>
    %48 = vector.broadcast %47 : vector<1x128xf32> to vector<16x128xf32>
    %49 = arith.addf %46, %48 : vector<16x128xf32>
    %cst_26 = arith.constant 0.000000e+00 : f32
    %50 = vector.broadcast %cst_26 : f32 to vector<16x128xf32>
    %51 = arith.maximumf %49, %50 : vector<16x128xf32>
    %c2_i32_27 = arith.constant 2 : i32
    %52 = tpu.dynamic_rotate %51 by %c2_i32_27 dim 0 : vector<16x128xf32>, i32 -> vector<16x128xf32>
    %53 = tpu.iota {dimensions = array<i32: 0>} : vector<16x128xi32>
    %c2_i32_28 = arith.constant 2 : i32
    %54 = vector.broadcast %c2_i32_28 : i32 to vector<16x128xi32>
    %55 = arith.cmpi sge, %53, %54 : vector<16x128xi32>
    %cst_29 = arith.constant 0.000000e+00 : f32
    %56 = vector.broadcast %cst_29 : f32 to vector<16x128xf32>
    %57 = arith.select %55, %52, %56 : vector<16x128xi1>, vector<16x128xf32>
    %58 = tpu.concatenate %57, %51 in 1 : vector<16x128xf32>, vector<16x128xf32> -> vector<16x256xf32>
    %59 = arith.truncf %58 : vector<16x256xf32> to vector<16x256xbf16>
    %c0_30 = arith.constant 0 : index
    %c0_31 = arith.constant 0 : index
    %60 = vector.load %arg8[%c0_30, %c0_31] : memref<256x128xbf16, #tpu.memory_space<vmem>>, vector<256x128xbf16>
    %cst_32 = arith.constant dense<0.000000e+00> : vector<16x128xf32>
    %61 = tpu.matmul %59, %60, %cst_32 {dimension_numbers = #tpu.dot_dimension_numbers<[1], [0], [0], [1], [0, 0, 1, 1], [], []>} : vector<16x256xbf16>, vector<256x128xbf16>, vector<16x128xf32> -> vector<16x128xf32>
    %c0_33 = arith.constant 0 : index
    %c0_34 = arith.constant 0 : index
    %62 = vector.load %arg9[%c0_33, %c0_34] : memref<1x128xf32, #tpu.memory_space<vmem>>, vector<1x128xf32>
    %63 = vector.broadcast %62 : vector<1x128xf32> to vector<16x128xf32>
    %64 = arith.addf %61, %63 : vector<16x128xf32>
    %cst_35 = arith.constant 0.000000e+00 : f32
    %65 = vector.broadcast %cst_35 : f32 to vector<16x128xf32>
    %66 = arith.maximumf %64, %65 : vector<16x128xf32>
    %67 = arith.addf %66, %36 : vector<16x128xf32>
    %cst_36 = arith.constant 0.000000e+00 : f32
    %68 = vector.broadcast %cst_36 : f32 to vector<16x128xf32>
    %69 = arith.maximumf %67, %68 : vector<16x128xf32>
    %70 = vector.shape_cast %69 : vector<16x128xf32> to vector<1x16x128xf32>
    %c0_37 = arith.constant 0 : index
    %c0_38 = arith.constant 0 : index
    %c0_39 = arith.constant 0 : index
    %71 = vector.load %arg10[%c0_37, %c0_38, %c0_39] : memref<1x16x128xf32, #tpu.memory_space<vmem>>, vector<1x16x128xf32>
    tpu.vector_store %arg10[%c0_37, %c0_38, %c0_39], %70 {strides = array<i32>} : memref<1x16x128xf32, #tpu.memory_space<vmem>>, vector<1x16x128xf32>,
    return
  }
  func.func @transform_0(%arg0: i32) -> (i32, i32, i32) {
    %c0_i32 = arith.constant 0 : i32
    %c0_i32_0 = arith.constant 0 : i32
    %c0_i32_1 = arith.constant 0 : i32
    return %arg0, %c0_i32, %c0_i32_0 : i32, i32, i32
  }
  func.func @transform_1(%arg0: i32) -> (i32, i32) {
    %c0_i32 = arith.constant 0 : i32
    %c0_i32_0 = arith.constant 0 : i32
    %c0_i32_1 = arith.constant 0 : i32
    return %c0_i32, %c0_i32_0 : i32, i32
  }
  func.func @transform_2(%arg0: i32) -> (i32, i32) {
    %c0_i32 = arith.constant 0 : i32
    %c0_i32_0 = arith.constant 0 : i32
    %c0_i32_1 = arith.constant 0 : i32
    return %c0_i32, %c0_i32_0 : i32, i32
  }
  func.func @transform_3(%arg0: i32) -> (i32, i32) {
    %c0_i32 = arith.constant 0 : i32
    %c0_i32_0 = arith.constant 0 : i32
    %c0_i32_1 = arith.constant 0 : i32
    return %c0_i32, %c0_i32_0 : i32, i32
  }
  func.func @transform_4(%arg0: i32) -> (i32, i32) {
    %c0_i32 = arith.constant 0 : i32
    %c0_i32_0 = arith.constant 0 : i32
    %c0_i32_1 = arith.constant 0 : i32
    return %c0_i32, %c0_i32_0 : i32, i32
  }
  func.func @transform_5(%arg0: i32) -> (i32, i32) {
    %c0_i32 = arith.constant 0 : i32
    %c0_i32_0 = arith.constant 0 : i32
    %c0_i32_1 = arith.constant 0 : i32
    return %c0_i32, %c0_i32_0 : i32, i32
  }
  func.func @transform_6(%arg0: i32) -> (i32, i32) {
    %c0_i32 = arith.constant 0 : i32
    %c0_i32_0 = arith.constant 0 : i32
    %c0_i32_1 = arith.constant 0 : i32
    return %c0_i32, %c0_i32_0 : i32, i32
  }
  func.func @transform_7(%arg0: i32) -> (i32, i32) {
    %c0_i32 = arith.constant 0 : i32
    %c0_i32_0 = arith.constant 0 : i32
    %c0_i32_1 = arith.constant 0 : i32
    return %c0_i32, %c0_i32_0 : i32, i32
  }
  func.func @transform_8(%arg0: i32) -> (i32, i32) {
    %c0_i32 = arith.constant 0 : i32
    %c0_i32_0 = arith.constant 0 : i32
    %c0_i32_1 = arith.constant 0 : i32
    return %c0_i32, %c0_i32_0 : i32, i32
  }
  func.func @transform_9(%arg0: i32) -> (i32, i32, i32) {
    %c0_i32 = arith.constant 0 : i32
    %c0_i32_0 = arith.constant 0 : i32
    %c0_i32_1 = arith.constant 0 : i32
    return %arg0, %c0_i32, %c0_i32_0 : i32, i32, i32
  }
}

</mosaic_0001>

<bundles_post_ra>
// kernel: tpu_custom_call.1
= control target key start
LH: loop header
LB: loop body
LE: loop exit
PB: predicated region body
PF: predicated region fallthrough
CT: control target
= control target key end

     0   :  { %s2382_s0 = inlined_call_operand.hbm [shape: f32[2,16,128], index: 0, kind: input, shape index: {}]   ;;  %s2383_s1 = inlined_call_operand.hbm [shape: bf16[256,256], index: 1, kind: input, shape index: {}]   ;;  %s2384_s2 = inlined_call_operand.vmem [shape: f32[1,256], index: 2, kind: input, shape index: {}]   ;;  %s2385_s3 = inlined_call_operand.hbm [shape: bf16[256,128], index: 3, kind: input, shape index: {}]   ;;  %s2386_s4 = inlined_call_operand.vmem [shape: f32[1,128], index: 4, kind: input, shape index: {}]   ;;  %s2387_s5 = inlined_call_operand.hbm [shape: bf16[256,128], index: 5, kind: input, shape index: {}]   ;;  %s2388_s6 = inlined_call_operand.vmem [shape: f32[1,128], index: 6, kind: input, shape index: {}]   ;;  %s2389_s7 = inlined_call_operand.hbm [shape: bf16[256,128], index: 7, kind: input, shape index: {}]   ;;  %s2390_s8 = inlined_call_operand.vmem [shape: f32[1,128], index: 8, kind: input, shape index: {}]   ;;  %s2391_s9 = inlined_call_operand.hbm [shape: f32[2,16,128], index: 9, kind: output, shape index: {}]  }
   0x1   :  { %2399 = sst [smem:[#allocation18_spill]] %s2390_s8 }
   0x2   :  { %2400 = sst [smem:[#allocation19_spill]] %s2391_s9 }
   0x3   :  { %14 = vsyncpa [#allocation3], 0 }
   0x4   :  { %16 = vsyncpa [#allocation3 + $0x1], 0 }
   0x5   :  { %17 = vsyncpa [#allocation6], 0 }
   0x6   :  { %18 = vsyncpa [#allocation9], 0 }
   0x7   :  { %19 = vsyncpa [#allocation4], 0 }
   0x8   :  { %21 = vsyncpa [#allocation4 + $0x1], 0  ;;  %s2027_s30 = smov 0   ;;  %s2029_s10 = smov 0  }
   0x9   :  { %s2031_s11 = smov 0   ;;  %s2033_s12 = smov 0  }
   0xa LB: > { %2401 = sst [smem:[#allocation16_spill]] %s1950_s30  ;;  %s2048_s13 = sadd.s32 4294967295, %s1962_s12   ;;  %s1962_s12 = sphi %s2033_s12, %s2431_s12   ;;  %s1958_s11 = sphi %s2031_s11, %s2430_s11   ;;  %s1954_s10 = sphi %s2029_s10, %s2429_s10   ;;  %s1950_s30 = sphi %s2027_s30, %s2428_s30  }
   0xb   : > { %s1371_s14 = sadd.s32 4294967294, %s1962_s12   ;;  %p47_p0 = scmp.ne.s32.totalorder %s1954_s10, %s1950_s30 }
   0xc   : > { %p2392_p1 = scmp.eq.s32.totalorder %s2048_s13, 0  ;;  %p245_p3 = scmp.eq.s32.totalorder %s1371_s14, 1 }
   0xd   : > { %p1372_p5 = scmp.ge.s32.totalorder %s1962_s12, 1  ;;  %p252_p7 = scmp.lt.s32.totalorder %s1962_s12, 3 }
   0xe   : > { %p2057_p4 = por %p2392_p1, %p47_p0  ;;  %p2062_p6 = por %p245_p3, %p47_p0 }
   0xf   : > { %p2067_p8 = pnand %p1372_p5, %p252_p7  ;;  %s1964_s18 = smov [#allocation5]  }
  0x10   : > { %s2402_s15 = scalar_select %p2057_p4, 1, 0 }
  0x11   : > { %s2403_s16 = scalar_select %p2062_p6, 1, 0 }
  0x12   : > { %s2405_s17 = scalar_select %p2067_p8, 1, 0 }
  0x13   : > { %2404 = sst [smem:[#allocation17_spill]] %s2403_s16  ;;  %s264_s19 = sshll.u32 %s1964_s18, 4  ;;  %s265_s19 = int_to_ptr.vmem [resolvable:$true] %s264_s19 }
  0x14   : > { %p1576_p9 = pneg %p2067_p8  ;;  %s1965_s21 = smov [#allocation8]  }
  0x15   : > { %s296_s22 = sshll.u32 %s1965_s21, 4  ;;  %s1746_s25 = scalar_lea.hbm %s2383_s1, 4096  ;;  %s297_s22 = int_to_ptr.vmem [resolvable:$true] %s296_s22 }
  0x16   : > { %p2076_p11 = pnand %p1576_p9, %p2392_p1  ;;  %p1747_p12 = scmp.ne.s32.totalorder %s2383_s1, %s1746_s25 }
  0x17   : > { %p1753_p5 = scmp.lt.u32.totalorder %s1746_s25, %s2383_s1 }
  0x18   : > { %p2088_p13 = pneg %p2076_p11 }
  0x1a   : > { %p1749_p0 = pnand %p2088_p13, %p1747_p12 }
  0x1c   : > { %p1750_p3 = pneg %p1749_p0 }
  0x1e   : > { %p1755_p7 = pnand %p1753_p5, %p1750_p3 }
  0x20   : > { %1758 = shalt.err (!%p1755_p7)
}
  0x21   : > { %s1759_s18 = scalar_lea.vmem %s265_s19, 4096  ;;  %p1767_p2 = scmp.lt.s32.totalorder %s265_s19, %s265_s19 }
  0x22   : > { %p1760_p9 = scmp.ne.s32.totalorder %s265_s19, %s1759_s18  ;;  %p1768_p6 = scmp.lt.s32.totalorder %s1759_s18, %s1759_s18 }
  0x24   : > { %p1762_p10 = pnand %p1760_p9, %p2088_p13  ;;  %p1769_p4 = por %p1768_p6, %p1767_p2 }
  0x26   : > { %p1763_p1 = pneg %p1762_p10 }
  0x28   : > { %p1770_p8 = pnand %p1769_p4, %p1763_p1 }
  0x2a   : > { %1773 = shalt.err (!%p1770_p8)
}
  0x2b   : > { %s2398_s21 = smov 128   ;;  %s1967_s23 = smov 8  }
  0x2c   : > { %1579 = dma.hbm_to_vmem [thread:$0]  (!%p2076_p11), %s2383_s1, 4096, %s265_s19, [#allocation6], %s2398_s21, %s2398_s21, %s1967_s23  }
  0x2d   : > { %s1968_s26 = smov [#allocation7]   ;;  %s1774_s18 = scalar_lea.hbm %s2387_s5, 2048 }
  0x2e   : > { %s280_s27 = sshll.u32 %s1968_s26, 4  ;;  %p1775_p1 = scmp.ne.s32.totalorder %s2387_s5, %s1774_s18  ;;  %s281_s27 = int_to_ptr.vmem [resolvable:$true] %s280_s27 }
  0x2f   : > { %p1781_p6 = scmp.lt.u32.totalorder %s1774_s18, %s2387_s5 }
  0x30   : > { %p1777_p2 = pnand %p1775_p1, %p2088_p13 }
  0x32   : > { %p1778_p4 = pneg %p1777_p2 }
  0x34   : > { %p1783_p8 = pnand %p1781_p6, %p1778_p4 }
  0x36   : > { %1786 = shalt.err (!%p1783_p8)
}
  0x37   : > { %s1787_s19 = scalar_lea.vmem %s297_s22, 2048  ;;  %p1795_p3 = scmp.lt.s32.totalorder %s297_s22, %s297_s22 }
  0x38   : > { %p1788_p10 = scmp.ne.s32.totalorder %s297_s22, %s1787_s19  ;;  %p1796_p5 = scmp.lt.s32.totalorder %s1787_s19, %s1787_s19 }
  0x3a   : > { %p1790_p12 = pnand %p1788_p10, %p2088_p13  ;;  %p1797_p7 = por %p1796_p5, %p1795_p3 }
  0x3c   : > { %p1791_p0 = pneg %p1790_p12 }
  0x3e   : > { %p1798_p9 = pnand %p1797_p7, %p1791_p0 }
  0x40   : > { %1801 = shalt.err (!%p1798_p9)
}
  0x41   : > { %s1969_s30 = smov 64   ;;  %s1970_s16 = smov 4  }
  0x42   : > { %1585 = dma.hbm_to_vmem [thread:$0]  (!%p2076_p11), %s2387_s5, 2048, %s297_s22, [#allocation9], %s1969_s30, %s1969_s30, %s1970_s16  }
  0x43   : > { %s1802_s26 = scalar_lea.hbm %s2385_s3, 2048 }
  0x44   : > { %p1803_p1 = scmp.ne.s32.totalorder %s2385_s3, %s1802_s26  ;;  %p1809_p6 = scmp.lt.u32.totalorder %s1802_s26, %s2385_s3 }
  0x46   : > { %p1805_p2 = pnand %p1803_p1, %p2088_p13 }
  0x48   : > { %p1806_p4 = pneg %p1805_p2 }
  0x4a   : > { %p1811_p8 = pnand %p1809_p6, %p1806_p4 }
  0x4c   : > { %1814 = shalt.err (!%p1811_p8)
}
  0x4d   : > { %s1815_s8 = scalar_lea.vmem %s281_s27, 2048  ;;  %p1823_p3 = scmp.lt.s32.totalorder %s281_s27, %s281_s27 }
  0x4e   : > { %p1816_p10 = scmp.ne.s32.totalorder %s281_s27, %s1815_s8  ;;  %p1824_p5 = scmp.lt.s32.totalorder %s1815_s8, %s1815_s8 }
  0x50   : > { %p1818_p12 = pnand %p1816_p10, %p2088_p13  ;;  %p1825_p7 = por %p1824_p5, %p1823_p3 }
  0x52   : > { %p1819_p0 = pneg %p1818_p12 }
  0x54   : > { %p1826_p9 = pnand %p1825_p7, %p1819_p0 }
  0x56   : > { %1829 = shalt.err (!%p1826_p9)
}
  0x57   : > { %1582 = dma.hbm_to_vmem [thread:$0]  (!%p2076_p11), %s2385_s3, 2048, %s281_s27, [#allocation6], %s1969_s30, %s1969_s30, %s1970_s16  }
  0x58   : > { %s1971_s24 = smov [#allocation10]   ;;  %s1830_s14 = scalar_lea.hbm %s2389_s7, 2048 }
  0x59   : > { %s312_s25 = sshll.u32 %s1971_s24, 4  ;;  %p1831_p1 = scmp.ne.s32.totalorder %s2389_s7, %s1830_s14  ;;  %s313_s25 = int_to_ptr.vmem [resolvable:$true] %s312_s25 }
  0x5a   : > { %p1837_p6 = scmp.lt.u32.totalorder %s1830_s14, %s2389_s7 }
  0x5b   : > { %p1833_p2 = pnand %p1831_p1, %p2088_p13 }
  0x5d   : > { %p1834_p4 = pneg %p1833_p2 }
  0x5f   : > { %p1839_p8 = pnand %p1837_p6, %p1834_p4 }
  0x61   : > { %1842 = shalt.err (!%p1839_p8)
}
  0x62   : > { %s1843_s27 = scalar_lea.vmem %s313_s25, 2048  ;;  %p1851_p3 = scmp.lt.s32.totalorder %s313_s25, %s313_s25 }
  0x63   : > { %p1844_p10 = scmp.ne.s32.totalorder %s313_s25, %s1843_s27  ;;  %p1852_p5 = scmp.lt.s32.totalorder %s1843_s27, %s1843_s27 }
  0x65   : > { %p1846_p12 = pnand %p1844_p10, %p2088_p13  ;;  %p1853_p7 = por %p1852_p5, %p1851_p3 }
  0x67   : > { %p1847_p0 = pneg %p1846_p12 }
  0x69   : > { %p1854_p9 = pnand %p1853_p7, %p1847_p0 }
  0x6b   : > { %1857 = shalt.err (!%p1854_p9)
}
  0x6c   : > { %1588 = dma.hbm_to_vmem [thread:$0]  (!%p2076_p11), %s2389_s7, 2048, %s313_s25, [#allocation9], %s1969_s30, %s1969_s30, %s1970_s16  }
  0x6d   : > { %s2171_s28 = sadd.s32 1, %s1962_s12   ;;  %s34_s20 = sadd.s32 1, %s1958_s11 }
  0x6e   : > { %s31_s9 = ssub.s32 %s1962_s12, %s2171_s28  ;;  %p41_p13 = scmp.ne.s32.totalorder %s1958_s11, %s1954_s10 }
  0x6f   : > { %p32_p1 = scmp.eq.s32.totalorder %s31_s9, 0  ;;  %p42_p2 = scmp.eq.s32.totalorder %s1962_s12, 0 }
  0x70   : > { %p2408_p4 = scmp.eq.s32.totalorder %s2048_s13, 1  ;;  %p1601_p8 = scmp.lt.s32.totalorder %s1962_s12, 2 }
  0x71   : > { %s2187_s26 = scalar_select %p32_p1, %s1958_s11, %s34_s20  }
  0x72   : > { %p2181_p6 = por %p2408_p4, %p41_p13  ;;  %p43_p10 = por %p42_p2, %p41_p13 }
  0x73   : > { %s329_s29 = sand.u32 1, %s1958_s11   ;;  %s1488_s30 = sshll.u32 %s1962_s12, 8 }
  0x74   : > { %s1378_s14 = sshll.u32 %s329_s29, 4  ;;  %s2194_s18 = scalar_lea.hbm %s2382_s0, %s1488_s30 }
  0x75   : > { %s333_s19 = scalar_lea.vmem [#allocation2], %s1378_s14  ;;  %p2198_p11 = pnand %p1601_p8, %p43_p10 }
  0x76   : > { %s340_s8 = sshll.u32 %s333_s19, 4  ;;  %s2202_s21 = scalar_lea.sflag [#allocation3], %s329_s29  ;;  %s2196_s8 = int_to_ptr.vmem [resolvable:$true] %s340_s8 }
  0x77   : > { %s1858_s22 = scalar_lea.hbm %s2194_s18, 256  ;;  %p1860_p0 = pneg %p2198_p11 }
  0x78   : > { %p1859_p12 = scmp.ne.s32.totalorder %s2194_s18, %s1858_s22  ;;  %s1863_s14 = scalar_lea.hbm %s2382_s0, 512 }
  0x79   : > { %p1864_p7 = scmp.lt.u32.totalorder %s2194_s18, %s2382_s0  ;;  %p1865_p9 = scmp.lt.u32.totalorder %s1863_s14, %s1858_s22 }
  0x7a   : > { %p1861_p3 = pnand %p1860_p0, %p1859_p12  ;;  %p1867_p1 = scmp.lt.u32.totalorder %s1858_s22, %s2194_s18 }
  0x7b   : > { %p1866_p13 = por %p1865_p9, %p1864_p7 }
  0x7c   : > { %p1862_p5 = pneg %p1861_p3 }
  0x7d   : > { %p1868_p2 = por %p1867_p1, %p1866_p13 }
  0x7f   : > { %p1869_p4 = pnand %p1868_p2, %p1862_p5 }
  0x81   : > { %1872 = shalt.err (!%p1869_p4)
}
  0x82   : > { %s1873_s29 = scalar_lea.vmem %s2196_s8, 256  ;;  %s1972_s25 = smov [#allocation2]  }
  0x83   : > { %p1874_p8 = scmp.ne.s32.totalorder %s2196_s8, %s1873_s29  ;;  %s1878_s19 = sshll.u32 %s1972_s25, 4  ;;  %s1879_s19 = int_to_ptr.vmem [resolvable:$false] %s1878_s19 }
  0x84   : > { %s1880_s20 = scalar_lea.vmem %s1879_s19, 512  ;;  %p1881_p3 = scmp.lt.s32.totalorder %s2196_s8, %s1879_s19 }
  0x85   : > { %p1876_p10 = pnand %p1874_p8, %p1860_p0  ;;  %p1882_p7 = scmp.lt.s32.totalorder %s1880_s20, %s1873_s29 }
  0x87   : > { %p1877_p12 = pneg %p1876_p10  ;;  %p1883_p9 = por %p1882_p7, %p1881_p3 }
  0x89   : > { %p1884_p13 = pnand %p1883_p9, %p1877_p12 }
  0x8b   : > { %1887 = shalt.err (!%p1884_p13)
}
  0x8c   : > { %s2411_s22 = smov 128   ;;  %p2412_p0 = scmp.ne.s32.totalorder %s2405_s17, 0 }
  0x8d   : > { %1592 = dma.hbm_to_vmem [thread:$0]  (!%p2198_p11), %s2194_s18, 256, %s2196_s8, %s2202_s21, %s2411_s22, %s2411_s22, %s1967_s23  }
  0x8e   : > { %352 = sbr.rel (%p2412_p0) target bundleno = 1141 (0x475), region = 56  ;;  %s2236_s9 = sand.u32 (!%p2412_p0), 1, %s1954_s10  }
  0x8f   : > { %s1382_s14 = sshll.u32 (!%p2412_p0), %s2236_s9, 4  ;;  %s355_s30 = scalar_lea.sflag (!%p2412_p0), [#allocation3], %s2236_s9 }
  0x90   : > { %s2242_s27 = scalar_lea.vmem (!%p2412_p0), [#allocation2], %s1382_s14  ;;  %p2413_p5 = scmp.ne.s32.totalorder (!%p2412_p0), %s2402_s15, 0 }
  0x95   : > { %1933 = dma.done.wait (%p2413_p5), %s355_s30, 256  }
  0x96   : > { %1935 = vsyncadd (%p2413_p5), %s355_s30, 4294967040  ;;  %p2414_p11 = scmp.eq.s32.totalorder %s2048_s13, 0 }
  0x98   : > { %1937 = dma.done.wait (%p2414_p11), [#allocation6], 6144   ;;  %p2415_p1 = pmov %p2414_p11 }
  0x9a   : > { %1939 = vsyncadd (%p2415_p1), [#allocation6], 4294961152  ;;  %p2416_p2 = pmov %p2415_p1 }
  0x9b   : > { %p2417_p4 = pmov %p2415_p1 }
  0x9c   : > { %1941 = dma.done.wait (%p2416_p2), [#allocation9], 4096  }
  0x9d   : > { %1943 = vsyncadd (%p2417_p4), [#allocation9], 4294963200  ;;  %v1650_v0 = vld [vmem:[#allocation5 + $0x4] ss:$8 sps:$4 sm:$0xff]   ;;  %v1652_v1 = vld [vmem:[#allocation5] ss:$8 sps:$4 sm:$0xff]   ;;  %v414_v25 = vlaneseq }
  0x9e   : > { %630 = vmatprep.subr.bf16.mxu0 %v1650_v0  ;;  %v1653_v2 = vld [vmem:[#allocation5 + $0x14] ss:$8 sps:$4 sm:$0xff]   ;;  %v1655_v3 = vld [vmem:[#allocation5 + $0x10] ss:$8 sps:$4 sm:$0xff]   ;;  %v1656_v4 = vld [vmem:[#allocation5 + $0x24] ss:$8 sps:$4 sm:$0xff]  }
  0x9f   : > { %631 = vmatpush1.bf16.msra.mxu0 %v1652_v1  ;;  %v1658_v5 = vld [vmem:[#allocation5 + $0x20] ss:$8 sps:$4 sm:$0xff]   ;;  %v1659_v6 = vld [vmem:[#allocation5 + $0x34] ss:$8 sps:$4 sm:$0xff]   ;;  %v1661_v7 = vld [vmem:[#allocation5 + $0x30] ss:$8 sps:$4 sm:$0xff]  }
  0xa0   : > { %632 = vmatprep.subr.bf16.mxu0 %v1653_v2  ;;  %v1662_v8 = vld [vmem:[#allocation5 + $0x44] ss:$8 sps:$4 sm:$0xff]   ;;  %v1664_v9 = vld [vmem:[#allocation5 + $0x40] ss:$8 sps:$4 sm:$0xff]   ;;  %v1665_v10 = vld [vmem:[#allocation5 + $0x54] ss:$8 sps:$4 sm:$0xff]  }
  0xa1   : > { %v1667_v11 = vld [vmem:[#allocation5 + $0x50] ss:$8 sps:$4 sm:$0xff]   ;;  %v1668_v12 = vld [vmem:[#allocation5 + $0x64] ss:$8 sps:$4 sm:$0xff]   ;;  %v1670_v13 = vld [vmem:[#allocation5 + $0x60] ss:$8 sps:$4 sm:$0xff]  }
  0xa2   : > { %v2257_v14 = vld [vmem:[%s2242_s27] sm:$0xff]  ;;  %v2260_v15 = vld [vmem:[%s2242_s27 + $0x8] sm:$0xff]  ;;  %v2266_v32 = vshrl.u32 %v414_v25, 7  ;;  %vm1973_vm2 = vmmov 1   ;;  %s2422_s25 = sld [smem:[#allocation18_spill]]  ;;  %s408_s19 = scalar_lea.vmem [#allocation11], %s1382_s14 }
  0xa3   : > { %633 = vmatpush1.bf16.msra.mxu0 %v1655_v3  ;;  %v1671_v16 = vld [vmem:[#allocation5 + $0x74] ss:$8 sps:$4 sm:$0xff]   ;;  %v425_v17 = vpack.c.bf16 %v2260_v15, %v2257_v14  ;;  %v1698_v18 = vld [vmem:[#allocation7 + $0x40] sm:$0xff]   ;;  %v1673_v20 = vld [vmem:[#allocation5 + $0x70] ss:$8 sps:$4 sm:$0xff]   ;;  %v412_v30 = vrot.slane %v2257_v14, 7 }
  0xa4   : > { %634 = vmatprep.subr.bf16.mxu0 %v1656_v4  ;;  %v1699_v19 = vld [vmem:[#allocation7] sm:$0xff]   ;;  %1490 = vmatprep.subr.bf16.mxu1 %v1698_v18  ;;  %v1700_v21 = vld [vmem:[#allocation7 + $0x48] sm:$0xff]   ;;  %v1702_v23 = vld [vmem:[#allocation7 + $0x50] sm:$0xff]   ;;  %v413_v31 = vrot.slane %v2260_v15, 7  ;;  %vm416_vm0 = vcmp.lt.s32.totalorder %v2266_v32, 1  ;;  %vm420_vm1 = vcmp.ge.s32.totalorder %v2266_v32, 1 }
  0xa5   : > { %662 = vmatprep.mubr.bf16.mxu0 %v425_v17  ;;  %1491 = vmatpush3.bf16.msra.mxu1 %v1699_v19  ;;  %v1701_v22 = vld [vmem:[#allocation7 + $0x8] sm:$0xff]   ;;  %v1677_v27 = vld [vmem:[#allocation5 + $0x94] ss:$8 sps:$4 sm:$0xff]   ;;  %v1679_v34 = vld [vmem:[#allocation5 + $0x90] ss:$8 sps:$4 sm:$0xff]   ;;  %v462_v60 = vsub.s32 0, %v2266_v32 }
  0xa6   : > { %1492 = vmatprep.subr.bf16.mxu1 %v1700_v21  ;;  %v1674_v24 = vld [vmem:[#allocation5 + $0x84] ss:$8 sps:$4 sm:$0xff]   ;;  %v1676_v26 = vld [vmem:[#allocation5 + $0x80] ss:$8 sps:$4 sm:$0xff]   ;;  %v1703_v28 = vld [vmem:[#allocation7 + $0x10] sm:$0xff]   ;;  %v417_v49 = vsel %vm416_vm0, %v412_v30, %v413_v31  ;;  %v418_v50 = vsel %vm416_vm0, %v413_v31, %v412_v30  ;;  %vm870_vm4 = vcmp.ge.s32.totalorder %v2266_v32, 2 }
  0xa7   : > { %635 = vmatpush1.bf16.msra.mxu0 %v1658_v5  ;;  %v1704_v29 = vld [vmem:[#allocation7 + $0x58] sm:$0xff]   ;;  %v1706_v35 = vld [vmem:[#allocation7 + $0x60] sm:$0xff]   ;;  %v1421_v51 = vpack.c.bf16 %v417_v49, %v418_v50  ;;  %vm2275_vm3 = vmpackc.low %vm1973_vm2, %vm420_vm1  ;;  %vm867_vm5 = vcmp.lt.s32.totalorder %v2266_v32, 2  ;;  %s1260_s20 = sshll.u32 %s408_s19, 4  ;;  %s1489_s22 = sshll.u32 %s2048_s13, 8  ;;  %s2333_s20 = int_to_ptr.vmem [resolvable:$true] %s1260_s20 }
  0xa8   : > { %636 = vmatprep.subr.bf16.mxu0 %v1659_v6  ;;  %v1705_v33 = vld [vmem:[#allocation7 + $0x18] sm:$0xff]   ;;  %v1680_v36 = vld [vmem:[#allocation5 + $0xa4] ss:$8 sps:$4 sm:$0xff]   ;;  %v1682_v38 = vld [vmem:[#allocation5 + $0xa0] ss:$8 sps:$4 sm:$0xff]   ;;  %s2423_s15 = sld [smem:[#allocation19_spill]] }
  0xa9   : > { %1493 = vmatpush3.bf16.msra.mxu1 %v1701_v22  ;;  %v1707_v37 = vld [vmem:[#allocation7 + $0x20] sm:$0xff]   ;;  %v1683_v39 = vld [vmem:[#allocation5 + $0xb4] ss:$8 sps:$4 sm:$0xff]   ;;  %v1685_v40 = vld [vmem:[#allocation5 + $0xb0] ss:$8 sps:$4 sm:$0xff]   ;;  %s1247_s14 = scalar_lea.sflag [#allocation4], %s2236_s9 }
  0xaa   : > { %1494 = vmatprep.subr.bf16.mxu1 %v1702_v23  ;;  %v1686_v41 = vld [vmem:[#allocation5 + $0xc4] ss:$8 sps:$4 sm:$0xff]   ;;  %v1688_v42 = vld [vmem:[#allocation5 + $0xc0] ss:$8 sps:$4 sm:$0xff]   ;;  %v1689_v43 = vld [vmem:[#allocation5 + $0xd4] ss:$8 sps:$4 sm:$0xff]  }
  0xab   : > { %637 = vmatpush1.bf16.msra.mxu0 %v1661_v7  ;;  %v1691_v44 = vld [vmem:[#allocation5 + $0xd0] ss:$8 sps:$4 sm:$0xff]   ;;  %v1692_v45 = vld [vmem:[#allocation5 + $0xe4] ss:$8 sps:$4 sm:$0xff]   ;;  %v1694_v46 = vld [vmem:[#allocation5 + $0xe0] ss:$8 sps:$4 sm:$0xff]  }
  0xac   : > { %638 = vmatprep.subr.bf16.mxu0 %v1662_v8  ;;  %v1695_v47 = vld [vmem:[#allocation5 + $0xf4] ss:$8 sps:$4 sm:$0xff]   ;;  %v1697_v48 = vld [vmem:[#allocation5 + $0xf0] ss:$8 sps:$4 sm:$0xff]   ;;  %v1708_v53 = vld [vmem:[#allocation7 + $0x68] sm:$0xff]   ;;  %s1888_s23 = scalar_lea.vmem %s2333_s20, 256 }
  0xad   : > { %1495 = vmatpush3.bf16.msra.mxu1 %v1703_v28  ;;  %v1709_v54 = vld [vmem:[#allocation7 + $0x28] sm:$0xff]   ;;  %v1710_v55 = vld [vmem:[#allocation7 + $0x70] sm:$0xff]   ;;  %v1712_v57 = vld [vmem:[#allocation7 + $0x78] sm:$0xff]   ;;  %p1889_p8 = scmp.ne.s32.totalorder %s2333_s20, %s1888_s23  ;;  %s1974_s13 = smov [#allocation11]  }
  0xae   : > { %1496 = vmatprep.subr.bf16.mxu1 %v1704_v29  ;;  %v1711_v56 = vld [vmem:[#allocation7 + $0x30] sm:$0xff]   ;;  %v1713_v58 = vld [vmem:[#allocation7 + $0x38] sm:$0xff]   ;;  %v1714_v59 = vld [vmem:[#allocation8 + $0x40] sm:$0xff]   ;;  %s2338_s17 = scalar_lea.hbm %s2423_s15, %s1489_s22  ;;  %s1892_s18 = sshll.u32 %s1974_s13, 4  ;;  %s1893_s18 = int_to_ptr.vmem [resolvable:$false] %s1892_s18 }
  0xaf   : > { %639 = vmatpush1.bf16.msra.mxu0 %v1664_v9  ;;  %v2285_v61 = vld [vmem:[%s2384_s2] sm:$0x3]  ;;  %v1716_v14 = vld [vmem:[#allocation8 + $0x48] sm:$0xff]   ;;  %v1719_v17 = vld [vmem:[#allocation8 + $0x10] sm:$0xff]   ;;  %p1890_p10 = pnand %p1889_p8, %p2181_p6  ;;  %s1894_s8 = scalar_lea.vmem %s1893_s18, 512 }
  0xb0   : > { %640 = vmatprep.subr.bf16.mxu0 %v1665_v10  ;;  %v463_v62 = vrot.slane %v2285_v61, %v462_v60  ;;  %v1717_v15 = vld [vmem:[#allocation8 + $0x8] sm:$0xff]   ;;  %v1720_v18 = vld [vmem:[#allocation8 + $0x58] sm:$0xff]   ;;  %v1723_v21 = vld [vmem:[#allocation8 + $0x20] sm:$0xff]   ;;  %p1895_p3 = scmp.lt.s32.totalorder %s2333_s20, %s1893_s18  ;;  %p1896_p7 = scmp.lt.s32.totalorder %s1894_s8, %s1888_s23 }
  0xb1   : > { %1497 = vmatpush3.bf16.msra.mxu1 %v1705_v33  ;;  %v1721_v19 = vld [vmem:[#allocation8 + $0x18] sm:$0xff]   ;;  %v1724_v22 = vld [vmem:[#allocation8 + $0x68] sm:$0xff]   ;;  %v1727_v25 = vld [vmem:[#allocation8 + $0x30] sm:$0xff]   ;;  %p1891_p12 = pneg %p1890_p10 }
  0xb2   : > { %1498 = vmatprep.subr.bf16.mxu1 %v1706_v35  ;;  %v1725_v23 = vld [vmem:[#allocation8 + $0x28] sm:$0xff]   ;;  %v1730_v28 = vld [vmem:[#allocation10 + $0x40] sm:$0xff]   ;;  %v1734_v33 = vld [vmem:[#allocation10 + $0x50] sm:$0xff]   ;;  %p1897_p9 = por %p1896_p7, %p1895_p3 }
  0xb3   : > { %641 = vmatpush1.bf16.msra.mxu0 %v1667_v11  ;;  %v1731_v29 = vld [vmem:[#allocation10] sm:$0xff]   ;;  %v1732_v30 = vld [vmem:[#allocation10 + $0x48] sm:$0xff]   ;;  %v1736_v35 = vld [vmem:[#allocation10 + $0x58] sm:$0xff]  }
  0xb4   : > { %642 = vmatprep.subr.bf16.mxu0 %v1668_v12  ;;  %v1715_v12 = vld [vmem:[#allocation8] sm:$0xff]   ;;  %v1733_v31 = vld [vmem:[#allocation10 + $0x8] sm:$0xff]   ;;  %vm2308_vm6 = vmpackc.low %vm1973_vm2, %vm870_vm4  ;;  %p1898_p13 = pnand %p1897_p9, %p1891_p12 }
  0xb5   : > { %1499 = vmatpush3.bf16.msra.mxu1 %v1707_v37  ;;  %v1738_v37 = vld [vmem:[#allocation10 + $0x60] sm:$0xff]  }
  0xb6   : > { %1500 = vmatprep.subr.bf16.mxu1 %v1708_v53 }
  0xb7   : > { %643 = vmatpush1.bf16.msra.mxu0 %v1670_v13 }
  0xb8   : > { %644 = vmatprep.subr.bf16.mxu0 %v1671_v16  ;;  %v1718_v16 = vld [vmem:[#allocation8 + $0x50] sm:$0xff]  }
  0xb9   : > { %1501 = vmatpush3.bf16.msra.mxu1 %v1709_v54 }
  0xba   : > { %1502 = vmatprep.subr.bf16.mxu1 %v1710_v55 }
  0xbb   : > { %645 = vmatpush1.bf16.msra.mxu0 %v1673_v20  ;;  %v1722_v20 = vld [vmem:[#allocation8 + $0x60] sm:$0xff]  }
  0xbc   : > { %646 = vmatprep.subr.bf16.mxu0 %v1674_v24  ;;  %v1726_v24 = vld [vmem:[#allocation8 + $0x70] sm:$0xff]  }
  0xbd   : > { %1503 = vmatpush3.bf16.msra.mxu1 %v1711_v56 }
  0xbe   : > { %1504 = vmatprep.subr.bf16.mxu1 %v1712_v57 }
  0xbf   : > { %647 = vmatpush1.bf16.msra.mxu0 %v1676_v26  ;;  %v1728_v26 = vld [vmem:[#allocation8 + $0x78] sm:$0xff]  }
  0xc0   : > { %648 = vmatprep.subr.bf16.mxu0 %v1677_v27  ;;  %v1729_v27 = vld [vmem:[#allocation8 + $0x38] sm:$0xff]  }
  0xc1   : > { %1505 = vmatpush3.bf16.msra.mxu1 %v1713_v58 }
  0xc2   : > { %1512 = vmatprep.subr.bf16.mxu1 %v1714_v59 }
  0xc3   : > { %649 = vmatpush1.bf16.msra.mxu0 %v1679_v34  ;;  %v1735_v34 = vld [vmem:[#allocation10 + $0x10] sm:$0xff]  }
  0xc4   : > { %650 = vmatprep.subr.bf16.mxu0 %v1680_v36  ;;  %v1737_v36 = vld [vmem:[#allocation10 + $0x18] sm:$0xff]  }
  0xc7   : > { %651 = vmatpush1.bf16.msra.mxu0 %v1682_v38  ;;  %v466_v38 = vsub.s32 1, %v2266_v32 }
  0xc8   : > { %652 = vmatprep.subr.bf16.mxu0 %v1683_v39 }
  0xcb   : > { %653 = vmatpush1.bf16.msra.mxu0 %v1685_v40  ;;  %v1423_v40 = vld [vmem:[%s2386_s4] ss:$0 sm:$0xff] }
  0xcc   : > { %654 = vmatprep.subr.bf16.mxu0 %v1686_v41 }
  0xcf   : > { %655 = vmatpush1.bf16.msra.mxu0 %v1688_v42  ;;  %v467_v42 = vrot.slane %v2285_v61, %v466_v38 }
  0xd0   : > { %656 = vmatprep.subr.bf16.mxu0 %v1689_v43 }
  0xd3   : > { %657 = vmatpush1.bf16.msra.mxu0 %v1691_v44 }
  0xd4   : > { %658 = vmatprep.subr.bf16.mxu0 %v1692_v45 }
  0xd7   : > { %659 = vmatpush1.bf16.msra.mxu0 %v1694_v46 }
  0xd8   : > { %660 = vmatprep.subr.bf16.mxu0 %v1695_v47 }
  0xdb   : > { %661 = vmatpush1.bf16.msra.mxu0 %v1697_v48 }
  0xdc   : > { %1534 = vmatprep.subr.bf16.mxu0 %v1730_v28 }
  0xde   : > { %1422 = vmatmul.mubr.msk.bf16.vlgmr.msra.gmra.mrb[0].mxu0 %vm2275_vm3, %v1421_v51 }
  0xdf   : > { %1535 = vmatpush3.bf16.msra.mxu0 %v1731_v29 }
  0xe0   : > { %1536 = vmatprep.subr.bf16.mxu0 %v1732_v30 }
  0xe3   : > { %1537 = vmatpush3.bf16.msra.mxu0 %v1733_v31 }
  0xe4   : > { %1538 = vmatprep.subr.bf16.mxu0 %v1734_v33 }
  0xe7   : > { %1539 = vmatpush3.bf16.msra.mxu0 %v1735_v34 }
  0xe8   : > { %1540 = vmatprep.subr.bf16.mxu0 %v1736_v35 }
  0xeb   : > { %1541 = vmatpush3.bf16.msra.mxu0 %v1737_v36 }
  0xec   : > { %1542 = vmatprep.subr.bf16.mxu0 %v1738_v37 }
 0x1b1   : > { %v664_v63 = vpop.f32.mrb[0].mxu0 }
 0x1b2   : > { %v665_v0 = vadd.f32 %v664_v63, %v463_v62  ;;  %v2288_v1 = vpop.f32.mrb[1].mxu0 }
 0x1b3   : > { %v668_v2 = vpop.f32.mrb[2].mxu0  ;;  %v667_v48 = vadd.f32 %v2288_v1, %v467_v42  ;;  %v1740_v1 = vld [vmem:[#allocation10 + $0x68] sm:$0xff]  }
 0x1b4   : > { %v673_v3 = vmax.f32 %v665_v0, 0.0  ;;  %v669_v4 = vadd.f32 %v668_v2, %v463_v62  ;;  %v2290_v5 = vpop.f32.mrb[3].mxu0  ;;  %v1739_v0 = vld [vmem:[#allocation10 + $0x20] sm:$0xff]   ;;  %v1741_v2 = vld [vmem:[#allocation10 + $0x28] sm:$0xff]  }
 0x1b5   : > { %v671_v51 = vadd.f32 %v2290_v5, %v467_v42  ;;  %1543 = vmatpush3.bf16.msra.mxu0 %v1739_v0  ;;  %v1744_v5 = vld [vmem:[#allocation10 + $0x78] sm:$0xff]  }
 0x1b6   : > { %v674_v6 = vmax.f32 %v669_v4, 0.0  ;;  %v675_v7 = vrot.slane %v673_v3, 7  ;;  %1544 = vmatprep.subr.bf16.mxu0 %v1740_v1  ;;  %v1743_v4 = vld [vmem:[#allocation10 + $0x30] sm:$0xff]  }
 0x1b8   : > { %v676_v8 = vrot.slane %v674_v6, 7  ;;  %v682_v9 = vpack.c.bf16 %v674_v6, %v673_v3  ;;  %v1742_v3 = vld [vmem:[#allocation10 + $0x70] sm:$0xff]   ;;  %v1745_v6 = vld [vmem:[#allocation10 + $0x38] sm:$0xff]  }
 0x1b9   : > { %1545 = vmatpush3.bf16.msra.mxu0 %v1741_v2 }
 0x1ba   : > { %v677_v10 = vsel %vm416_vm0, %v675_v7, %v676_v8  ;;  %v678_v11 = vsel %vm416_vm0, %v676_v8, %v675_v7  ;;  %850 = vmatprep.mubr.bf16.mxu1 %v682_v9  ;;  %1546 = vmatprep.subr.bf16.mxu0 %v1742_v3  ;;  %v1443_v8 = vld [vmem:[%s2388_s6] ss:$0 sm:$0xff] }
 0x1bb   : > { %v1441_v13 = vpack.c.bf16 %v677_v10, %v678_v11 }
 0x1bd   : > { %1442 = vmatmul.mubr.msk.bf16.vlgmr.msra.gmra.mrb[0].mxu1 %vm2275_vm3, %v1441_v13  ;;  %1547 = vmatpush3.bf16.msra.mxu0 %v1743_v4 }
 0x1be   : > { %1513 = vmatpush3.bf16.msra.mxu1 %v1715_v12  ;;  %1548 = vmatprep.subr.bf16.mxu0 %v1744_v5 }
 0x1bf   : > { %1514 = vmatprep.subr.bf16.mxu1 %v1716_v14 }
 0x1c1   : > { %1549 = vmatpush3.bf16.msra.mxu0 %v1745_v6 }
 0x1c2   : > { %1515 = vmatpush3.bf16.msra.mxu1 %v1717_v15 }
 0x1c3   : > { %1516 = vmatprep.subr.bf16.mxu1 %v1718_v16 }
 0x1c6   : > { %1517 = vmatpush3.bf16.msra.mxu1 %v1719_v17 }
 0x1c7   : > { %1518 = vmatprep.subr.bf16.mxu1 %v1720_v18 }
 0x1ca   : > { %1519 = vmatpush3.bf16.msra.mxu1 %v1721_v19 }
 0x1cb   : > { %1520 = vmatprep.subr.bf16.mxu1 %v1722_v20 }
 0x1ce   : > { %1521 = vmatpush3.bf16.msra.mxu1 %v1723_v21 }
 0x1cf   : > { %1522 = vmatprep.subr.bf16.mxu1 %v1724_v22 }
 0x1d2   : > { %1523 = vmatpush3.bf16.msra.mxu1 %v1725_v23 }
 0x1d3   : > { %1524 = vmatprep.subr.bf16.mxu1 %v1726_v24 }
 0x1d6   : > { %1525 = vmatpush3.bf16.msra.mxu1 %v1727_v25  ;;  %v1463_v25 = vld [vmem:[%s2422_s25] ss:$0 sm:$0xff] }
 0x1d7   : > { %1526 = vmatprep.subr.bf16.mxu1 %v1728_v26 }
 0x1da   : > { %1527 = vmatpush3.bf16.msra.mxu1 %v1729_v27 }
 0x290   : > { %v1506_v39 = vpop.f32.mrb[0].mxu1 }
 0x291   : > { %v1507_v41 = vpop.f32.mrb[1].mxu1 }
 0x292   : > { %v1508_v43 = vadd.f32 %v1507_v41, %v1506_v39  ;;  %v1509_v44 = vpop.f32.mrb[2].mxu1 }
 0x293   : > { %v1510_v45 = vpop.f32.mrb[3].mxu1 }
 0x294   : > { %v853_v46 = vadd.f32 %v1508_v43, %v1423_v40  ;;  %v1511_v47 = vadd.f32 %v1510_v45, %v1509_v44 }
 0x296   : > { %v859_v49 = vmax.f32 %v853_v46, 0.0  ;;  %v856_v50 = vadd.f32 %v1511_v47, %v1423_v40 }
 0x298   : > { %v861_v52 = vadd.f32 %v859_v49, %v667_v48  ;;  %v860_v53 = vmax.f32 %v856_v50, 0.0 }
 0x29a   : > { %v863_v54 = vmax.f32 %v861_v52, 0.0  ;;  %v862_v55 = vadd.f32 %v860_v53, %v671_v51 }
 0x29c   : > { %v864_v56 = vmax.f32 %v862_v55, 0.0  ;;  %v865_v57 = vrot.slane %v863_v54, 6 }
 0x29e   : > { %v866_v58 = vrot.slane %v864_v56, 6  ;;  %v875_v59 = vpack.c.bf16 %v864_v56, %v863_v54 }
 0x2a0   : > { %1043 = vmatprep.mubr.bf16.mxu1 %v875_v59  ;;  %v868_v61 = vsel %vm867_vm5, %v865_v57, %v866_v58  ;;  %v869_v62 = vsel %vm867_vm5, %v866_v58, %v865_v57 }
 0x2a1   : > { %v1461_v63 = vpack.c.bf16 %v868_v61, %v869_v62 }
 0x2a3   : > { %1462 = vmatmul.mubr.msk.bf16.vlgmr.msra.gmra.mrb[4].mxu1 %vm2308_vm6, %v1461_v63 }
 0x376   : > { %v1528_v7 = vpop.f32.mrb[4].mxu1 }
 0x377   : > { %v1529_v9 = vpop.f32.mrb[5].mxu1 }
 0x378   : > { %v1530_v10 = vadd.f32 %v1529_v9, %v1528_v7  ;;  %v1531_v11 = vpop.f32.mrb[6].mxu1 }
 0x379   : > { %v1532_v12 = vpop.f32.mrb[7].mxu1 }
 0x37a   : > { %v1046_v13 = vadd.f32 %v1530_v10, %v1443_v8  ;;  %v1533_v14 = vadd.f32 %v1532_v12, %v1531_v11 }
 0x37c   : > { %v1052_v15 = vmax.f32 %v1046_v13, 0.0  ;;  %v1049_v16 = vadd.f32 %v1533_v14, %v1443_v8 }
 0x37e   : > { %v1053_v17 = vmax.f32 %v1049_v16, 0.0  ;;  %v1054_v18 = vrot.slane %v1052_v15, 6 }
 0x380   : > { %v1055_v19 = vrot.slane %v1053_v17, 6  ;;  %v1061_v20 = vpack.c.bf16 %v1053_v17, %v1052_v15 }
 0x382   : > { %v1056_v21 = vsel %vm867_vm5, %v1054_v18, %v1055_v19  ;;  %v1057_v22 = vsel %vm867_vm5, %v1055_v19, %v1054_v18  ;;  %1229 = vmatprep.mubr.bf16.mxu0 %v1061_v20 }
 0x383   : > { %v1481_v23 = vpack.c.bf16 %v1056_v21, %v1057_v22 }
 0x385   : > { %1482 = vmatmul.mubr.msk.bf16.vlgmr.msra.gmra.mrb[4].mxu0 %vm2308_vm6, %v1481_v23 }
 0x458   : > { %v1550_v24 = vpop.f32.mrb[4].mxu0 }
 0x459   : > { %v1551_v26 = vpop.f32.mrb[5].mxu0 }
 0x45a   : > { %v1552_v27 = vadd.f32 %v1551_v26, %v1550_v24  ;;  %v1553_v28 = vpop.f32.mrb[6].mxu0 }
 0x45b   : > { %v1554_v29 = vpop.f32.mrb[7].mxu0 }
 0x45c   : > { %v1232_v30 = vadd.f32 %v1552_v27, %v1463_v25  ;;  %v1555_v31 = vadd.f32 %v1554_v29, %v1553_v28 }
 0x45e   : > { %v1238_v32 = vmax.f32 %v1232_v30, 0.0  ;;  %v1235_v33 = vadd.f32 %v1555_v31, %v1463_v25 }
 0x460   : > { %v1240_v34 = vadd.f32 %v1238_v32, %v863_v54  ;;  %v1239_v35 = vmax.f32 %v1235_v33, 0.0 }
 0x462   : > { %v1242_v36 = vmax.f32 %v1240_v34, 0.0  ;;  %v1241_v37 = vadd.f32 %v1239_v35, %v864_v56 }
 0x464   : > { %1244 = vst [vmem:[%s408_s19] sm:$0xff] %v1242_v36  ;;  %v1243_v38 = vmax.f32 %v1241_v37, 0.0 }
 0x466   : > { %1245 = vst [vmem:[%s408_s19 + $0x8] sm:$0xff] %v1243_v38 }
 0x467   : > { %1901 = shalt.err (!%p1898_p13)
}
 0x468   : > { %s1902_s21 = scalar_lea.hbm %s2338_s17, 256  ;;  %s1906_s25 = scalar_lea.hbm %s2423_s15, 512 }
 0x469   : > { %p1903_p0 = scmp.ne.s32.totalorder %s2338_s17, %s1902_s21  ;;  %p1907_p1 = scmp.lt.u32.totalorder %s2338_s17, %s2423_s15 }
 0x46a   : > { %p1908_p2 = scmp.lt.u32.totalorder %s1906_s25, %s1902_s21  ;;  %p1910_p8 = scmp.lt.u32.totalorder %s1902_s21, %s2338_s17 }
 0x46b   : > { %p1904_p5 = pnand %p1903_p0, %p2181_p6 }
 0x46c   : > { %p1909_p4 = por %p1908_p2, %p1907_p1 }
 0x46d   : > { %p1905_p11 = pneg %p1904_p5 }
 0x46e   : > { %p1911_p10 = por %p1910_p8, %p1909_p4 }
 0x470   : > { %p1912_p12 = pnand %p1911_p10, %p1905_p11 }
 0x472   : > { %1915 = shalt.err (!%p1912_p12)
}
 0x473   : > { %s1975_s30 = smov 128   ;;  %s1976_s27 = smov 8  }
 0x474   : > { %1574 = dma.vmem_to_hbm [thread:$0]  (%p2181_p6), %s2333_s20, 256, %s2338_s17, %s1247_s14, %s1975_s30, %s1975_s30, %s1976_s27  }
 0x475 PF: > { %s2424_s23 = sld [smem:[#allocation16_spill]]  ;;  %s2425_s13 = sld [smem:[#allocation17_spill]] }
 0x476   : > { %p2427_p7 = scmp.ge.s32.totalorder %s1962_s12, 2 }
 0x47b   : > { %s1275_s18 = sand.u32 1, %s2424_s23   ;;  %p2426_p3 = scmp.ne.s32.totalorder %s2425_s13, 0 }
 0x47c   : > { %s1276_s8 = scalar_lea.sflag [#allocation4], %s1275_s18 }
 0x47d   : > { %p1594_p9 = pnand %p2427_p7, %p2426_p3 }
 0x47f   : > { %1945 = dma.done.wait (!%p1594_p9), %s1276_s8, 256  }
 0x480   : > { %1947 = vsyncadd (!%p1594_p9), %s1276_s8, 4294967040  ;;  %p24_p13 = scmp.ge.s32.totalorder %s2171_s28, 4   ;;  %s2428_s30 = smov %s1954_s10 }
 0x481   : > { %s2429_s10 = smov %s1958_s11  ;;  %s2430_s11 = smov %s2187_s26 }
 0x482   : > { %s2431_s12 = smov %s2171_s28  ;;  %26 = sbr.rel (!%p24_p13) target bundleno = 10 (0xa), region = 117 }
 0x489   :  { %1281 = vsyncpa [#allocation3], 1 }
 0x48a   :  { %1283 = vsyncpa [#allocation3 + $0x1], 1 }
 0x48b   :  { %1284 = vsyncpa [#allocation6], 1 }
 0x48c   :  { %1285 = vsyncpa [#allocation9], 1 }
 0x48d   :  { %1286 = vsyncpa [#allocation4], 1 }
 0x48e   :  { %1288 = vsyncpa [#allocation4 + $0x1], 1 }

</bundles_post_ra>
